<compile_context>
chip_gen: v6e
topology: v6e:2x2x1
jax: 0.10.0
libtpu: 0.0.40
codegen_flags: <defaults>
</compile_context>

<pallas_src>
import math
import functools

import jax
import jax.numpy as jnp
from jax.experimental import pallas as pl
from jax.experimental.pallas import tpu as pltpu

_INV_SQRT2 = 1.0 / math.sqrt(2.0)


def _ffn_kernel(x_ref, w1_ref, b1_ref, w2_ref, b2_ref, o_ref, acc_ref):
    # x_ref: (tm, E)   w1_ref: (E, th)   b1_ref: (1, th)
    # w2_ref: (th, E)  b2_ref: (1, E)    o_ref: (tm, E)   acc_ref: (tm, E) f32
    h_idx = pl.program_id(1)

    @pl.when(h_idx == 0)
    def _init():
        acc_ref[...] = jnp.zeros_like(acc_ref)

    x = x_ref[...]

    # First linear partial (MXU), f32 accumulate, + per-H-tile slice of b1.
    h = jnp.dot(x, w1_ref[...], preferred_element_type=jnp.float32) + b1_ref[...]

    # Exact GELU (erf form) -- matches PyTorch nn.GELU() default.  Kept in f32;
    # erf runs on the EUP so it overlaps with the MXU work.
    h = 0.5 * h * (1.0 + jax.lax.erf(h * _INV_SQRT2))

    # Second linear partial; accumulate across H tiles in the f32 scratch.
    acc_ref[...] += jnp.dot(h.astype(x.dtype), w2_ref[...],
                            preferred_element_type=jnp.float32)

    @pl.when(h_idx == pl.num_programs(1) - 1)
    def _finalize():
        # b2 added exactly once, then cast + lane-dense store.
        o_ref[...] = (acc_ref[...] + b2_ref[...]).astype(o_ref.dtype)


def _round_up(x, m):
    return ((x + m - 1) // m) * m


def _vmem_bytes(tm, th, E, itemsize):
    """Double-buffered input/output tiles + resident f32 accumulator."""
    dbl = 2 * itemsize * (tm * E      # x tile
                          + E * th    # W1 tile
                          + th        # b1 tile
                          + th * E    # W2 tile
                          + E         # b2
                          + tm * E)   # out tile
    return dbl + tm * E * 4          # f32 accumulator


def _pick_th(H, E, tm, itemsize, block_h, budget):
    """Largest 128-multiple dividing H, <= block_h, fitting the VMEM budget."""
    if H % 128 != 0:
        return H  # block must equal the full array dim in this case
    th = (min(block_h, H) // 128) * 128
    while th >= 128:
        if H % th == 0 and _vmem_bytes(tm, th, E, itemsize) <= budget:
            return th
        th -= 128
    return 128  # fall back; vmem_limit is raised accordingly


@functools.partial(jax.jit, static_argnames=("block_m", "block_h"))
def feed_forward(x, w1, b1, w2, b2, block_m=256, block_h=2048):
    """x: (B, T, E). Returns (B, T, E). Fused eval-mode MLP kernel."""
    B, T, E = x.shape
    H = w1.shape[1]
    M = B * T
    x2d = x.reshape(M, E)
    itemsize = jnp.dtype(x.dtype).itemsize

    # Row tile: multiple of 8 (f32 sublane); pad rows so the grid is exact.
    tm = min(block_m, _round_up(M, 8))
    M_pad = _round_up(M, tm)
    if M_pad != M:
        x2d = jnp.pad(x2d, ((0, M_pad - M), (0, 0)))

    # Hidden-dim reduction tile: multiple of 128 (lane width) dividing H,
    # chosen so the working set stays under a conservative VMEM budget
    # (v7x has only 64 MiB per TensorCore).
    vmem_budget = 44 * 1024 * 1024
    th = _pick_th(H, E, tm, itemsize, block_h, vmem_budget)
    grid = (M_pad // tm, H // th)

    est = _vmem_bytes(tm, th, E, itemsize)
    vmem_limit = int(min(64 * 1024 * 1024, max(32 * 1024 * 1024, 2 * est)))

    cost = pl.CostEstimate(
        flops=4 * M_pad * E * H,                # two matmuls
        transcendentals=M_pad * H,              # erf
        bytes_accessed=(x2d.size + w1.size + b1.size + w2.size + b2.size
                        + M_pad * E) * itemsize,
    )

    out2d = pl.pallas_call(
        _ffn_kernel,
        out_shape=jax.ShapeDtypeStruct((M_pad, E), x.dtype),
        grid_spec=pltpu.PrefetchScalarGridSpec(
            num_scalar_prefetch=0,
            grid=grid,
            in_specs=[
                pl.BlockSpec((tm, E), lambda m, h: (m, 0)),   # x rows (resident over h)
                pl.BlockSpec((E, th), lambda m, h: (0, h)),   # W1 H-tile
                pl.BlockSpec((1, th), lambda m, h: (0, h)),   # b1 H-tile
                pl.BlockSpec((th, E), lambda m, h: (h, 0)),   # W2 H-tile
                pl.BlockSpec((1, E), lambda m, h: (0, 0)),    # b2 (constant)
            ],
            out_specs=pl.BlockSpec((tm, E), lambda m, h: (m, 0)),
            scratch_shapes=[pltpu.VMEM((tm, E), jnp.float32)],  # f32 accumulator
        ),
        compiler_params=pltpu.CompilerParams(
            dimension_semantics=("parallel", "arbitrary"),
            vmem_limit_bytes=vmem_limit,
        ),
        cost_estimate=cost,
    )(x2d, w1, b1, w2, b2)

    return out2d[:M].reshape(B, T, E)


def _init_params(key, embed_dim, dtype=jnp.float32):
    """Deterministic PyTorch-style (uniform ±1/sqrt(fan_in)) init."""
    hidden = 4 * embed_dim
    k1, k2, k3, k4 = jax.random.split(key, 4)
    bound1 = 1.0 / math.sqrt(embed_dim)
    bound2 = 1.0 / math.sqrt(hidden)
    # Stored transposed relative to torch's (out, in) so the kernel does x @ W.
    w1 = jax.random.uniform(k1, (embed_dim, hidden), dtype, -bound1, bound1)
    b1 = jax.random.uniform(k2, (1, hidden), dtype, -bound1, bound1)
    w2 = jax.random.uniform(k3, (hidden, embed_dim), dtype, -bound2, bound2)
    b2 = jax.random.uniform(k4, (1, embed_dim), dtype, -bound2, bound2)
    return w1, b1, w2, b2


def _reference(x, w1, b1, w2, b2):
    h = x @ w1 + b1[0]
    h = 0.5 * h * (1.0 + jax.lax.erf(h * _INV_SQRT2))
    return h @ w2 + b2[0]


if __name__ == "__main__":
    key = jax.random.PRNGKey(0)
    kx, kp, kx2 = jax.random.split(key, 3)

    # Small config: batch=2, seq=8, embed_dim=32 -> hidden=128.
    B, T, E = 2, 8, 32
    x = jax.random.normal(kx, (B, T, E), jnp.float32)
    w1, b1, w2, b2 = _init_params(kp, E)

    out = feed_forward(x, w1, b1, w2, b2)
    out = jax.block_until_ready(out)
    ref = _reference(x, w1, b1, w2, b2)
    assert out.shape == (B, T, E)
    assert jnp.allclose(out, ref, atol=1e-5, rtol=1e-5), "mismatch vs reference"

    # Ragged-row config (B*T not a multiple of the row tile) exercises padding.
    B2, T2 = 1, 13
    x2 = jax.random.normal(kx2, (B2, T2, E), jnp.float32)
    out2 = jax.block_until_ready(feed_forward(x2, w1, b1, w2, b2))
    ref2 = _reference(x2, w1, b1, w2, b2)
    assert out2.shape == (B2, T2, E)
    assert jnp.allclose(out2, ref2, atol=1e-5, rtol=1e-5), "mismatch vs reference (ragged)"

    print("KERNEL_OK")
</pallas_src>

<mosaic_0001>
module attributes {stable_mosaic.version = 11 : i64} {
  func.func @_ffn_kernel(%arg0: i32, %arg1: i32, %arg2: memref<16x32xf32, #tpu.memory_space<vmem>>, %arg3: memref<32x128xf32, #tpu.memory_space<vmem>>, %arg4: memref<1x128xf32, #tpu.memory_space<vmem>>, %arg5: memref<128x32xf32, #tpu.memory_space<vmem>>, %arg6: memref<1x32xf32, #tpu.memory_space<vmem>>, %arg7: memref<16x32xf32, #tpu.memory_space<vmem>>, %arg8: memref<16x32xf32, #tpu.memory_space<vmem>>) attributes {dimension_semantics = [#tpu.dimension_semantics<parallel>, #tpu.dimension_semantics<arbitrary>], iteration_bounds = array<i64: 1, 1>, scalar_prefetch = 0 : i64, scratch_operands = 1 : i64, tpu.core_type = #tpu.core_type<tc>, window_params = [{transform_indices = @transform_0, window_bounds = array<i64: 16, 32>}, {transform_indices = @transform_1, window_bounds = array<i64: 32, 128>}, {transform_indices = @transform_2, window_bounds = array<i64: 1, 128>}, {transform_indices = @transform_3, window_bounds = array<i64: 128, 32>}, {pipeline_mode = #tpu.pipeline_mode<synchronous>, transform_indices = @transform_4, window_bounds = array<i64: 1, 32>}, {transform_indices = @transform_5, window_bounds = array<i64: 16, 32>}]} {
    %c0_i32 = arith.constant 0 : i32
    %0 = arith.cmpi eq, %arg1, %c0_i32 : i32
    %1 = arith.extui %0 : i1 to i32
    %c0_i32_0 = arith.constant 0 : i32
    %2 = arith.cmpi ne, %1, %c0_i32_0 : i32
    scf.if %2 {
      %cst_18 = arith.constant 0.000000e+00 : f32
      %25 = vector.broadcast %cst_18 : f32 to vector<16x32xf32>
      %c0_19 = arith.constant 0 : index
      %c0_20 = arith.constant 0 : index
      %26 = vector.load %arg8[%c0_19, %c0_20] : memref<16x32xf32, #tpu.memory_space<vmem>>, vector<16x32xf32>
      tpu.vector_store %arg8[%c0_19, %c0_20], %25 {strides = array<i32>} : memref<16x32xf32, #tpu.memory_space<vmem>>, vector<16x32xf32>,
    } else {
    }
    %c0 = arith.constant 0 : index
    %c0_1 = arith.constant 0 : index
    %3 = vector.load %arg2[%c0, %c0_1] : memref<16x32xf32, #tpu.memory_space<vmem>>, vector<16x32xf32>
    %c0_2 = arith.constant 0 : index
    %c0_3 = arith.constant 0 : index
    %4 = vector.load %arg3[%c0_2, %c0_3] : memref<32x128xf32, #tpu.memory_space<vmem>>, vector<32x128xf32>
    %cst = arith.constant dense<0.000000e+00> : vector<16x128xf32>
    %5 = tpu.matmul %3, %4, %cst {dimension_numbers = #tpu.dot_dimension_numbers<[1], [0], [0], [1], [0, 0, 1, 1], [], []>} : vector<16x32xf32>, vector<32x128xf32>, vector<16x128xf32> -> vector<16x128xf32>
    %c0_4 = arith.constant 0 : index
    %c0_5 = arith.constant 0 : index
    %6 = vector.load %arg4[%c0_4, %c0_5] : memref<1x128xf32, #tpu.memory_space<vmem>>, vector<1x128xf32>
    %7 = vector.broadcast %6 : vector<1x128xf32> to vector<16x128xf32>
    %8 = arith.addf %5, %7 : vector<16x128xf32>
    %cst_6 = arith.constant 5.000000e-01 : f32
    %9 = vector.broadcast %cst_6 : f32 to vector<16x128xf32>
    %10 = arith.mulf %9, %8 : vector<16x128xf32>
    %cst_7 = arith.constant 0.707106769 : f32
    %11 = vector.broadcast %cst_7 : f32 to vector<16x128xf32>
    %12 = arith.mulf %8, %11 : vector<16x128xf32>
    %13 = math.erf %12 : vector<16x128xf32>
    %cst_8 = arith.constant 1.000000e+00 : f32
    %14 = vector.broadcast %cst_8 : f32 to vector<16x128xf32>
    %15 = arith.addf %14, %13 : vector<16x128xf32>
    %16 = arith.mulf %10, %15 : vector<16x128xf32>
    %c0_9 = arith.constant 0 : index
    %c0_10 = arith.constant 0 : index
    %17 = vector.load %arg8[%c0_9, %c0_10] : memref<16x32xf32, #tpu.memory_space<vmem>>, vector<16x32xf32>
    %c0_11 = arith.constant 0 : index
    %c0_12 = arith.constant 0 : index
    %18 = vector.load %arg5[%c0_11, %c0_12] : memref<128x32xf32, #tpu.memory_space<vmem>>, vector<128x32xf32>
    %cst_13 = arith.constant dense<0.000000e+00> : vector<16x32xf32>
    %19 = tpu.matmul %16, %18, %cst_13 {dimension_numbers = #tpu.dot_dimension_numbers<[1], [0], [0], [1], [0, 0, 1, 1], [], []>} : vector<16x128xf32>, vector<128x32xf32>, vector<16x32xf32> -> vector<16x32xf32>
    %20 = arith.addf %17, %19 : vector<16x32xf32>
    %c0_14 = arith.constant 0 : index
    %c0_15 = arith.constant 0 : index
    %21 = vector.load %arg8[%c0_14, %c0_15] : memref<16x32xf32, #tpu.memory_space<vmem>>, vector<16x32xf32>
    tpu.vector_store %arg8[%c0_14, %c0_15], %20 {strides = array<i32>} : memref<16x32xf32, #tpu.memory_space<vmem>>, vector<16x32xf32>,
    %c0_i32_16 = arith.constant 0 : i32
    %22 = arith.cmpi eq, %arg1, %c0_i32_16 : i32
    %23 = arith.extui %22 : i1 to i32
    %c0_i32_17 = arith.constant 0 : i32
    %24 = arith.cmpi ne, %23, %c0_i32_17 : i32
    scf.if %24 {
      %c0_18 = arith.constant 0 : index
      %c0_19 = arith.constant 0 : index
      %25 = vector.load %arg8[%c0_18, %c0_19] : memref<16x32xf32, #tpu.memory_space<vmem>>, vector<16x32xf32>
      %c0_20 = arith.constant 0 : index
      %c0_21 = arith.constant 0 : index
      %26 = vector.load %arg6[%c0_20, %c0_21] : memref<1x32xf32, #tpu.memory_space<vmem>>, vector<1x32xf32>
      %27 = vector.broadcast %26 : vector<1x32xf32> to vector<16x32xf32>
      %28 = arith.addf %25, %27 : vector<16x32xf32>
      %c0_22 = arith.constant 0 : index
      %c0_23 = arith.constant 0 : index
      %29 = vector.load %arg7[%c0_22, %c0_23] : memref<16x32xf32, #tpu.memory_space<vmem>>, vector<16x32xf32>
      tpu.vector_store %arg7[%c0_22, %c0_23], %28 {strides = array<i32>} : memref<16x32xf32, #tpu.memory_space<vmem>>, vector<16x32xf32>,
    } else {
    }
    return
  }
  func.func @transform_0(%arg0: i32, %arg1: i32) -> (i32, i32) {
    %c0_i32 = arith.constant 0 : i32
    %c0_i32_0 = arith.constant 0 : i32
    return %arg0, %c0_i32 : i32, i32
  }
  func.func @transform_1(%arg0: i32, %arg1: i32) -> (i32, i32) {
    %c0_i32 = arith.constant 0 : i32
    %c0_i32_0 = arith.constant 0 : i32
    return %c0_i32, %arg1 : i32, i32
  }
  func.func @transform_2(%arg0: i32, %arg1: i32) -> (i32, i32) {
    %c0_i32 = arith.constant 0 : i32
    %c0_i32_0 = arith.constant 0 : i32
    return %c0_i32, %arg1 : i32, i32
  }
  func.func @transform_3(%arg0: i32, %arg1: i32) -> (i32, i32) {
    %c0_i32 = arith.constant 0 : i32
    %c0_i32_0 = arith.constant 0 : i32
    return %arg1, %c0_i32 : i32, i32
  }
  func.func @transform_4(%arg0: i32, %arg1: i32) -> (i32, i32) {
    %c0_i32 = arith.constant 0 : i32
    %c0_i32_0 = arith.constant 0 : i32
    %c0_i32_1 = arith.constant 0 : i32
    return %c0_i32, %c0_i32_0 : i32, i32
  }
  func.func @transform_5(%arg0: i32, %arg1: i32) -> (i32, i32) {
    %c0_i32 = arith.constant 0 : i32
    %c0_i32_0 = arith.constant 0 : i32
    return %arg0, %c0_i32 : i32, i32
  }
}

</mosaic_0001>

<bundles_post_ra>
// kernel: feed_forward.1
= control target key start
LH: loop header
LB: loop body
LE: loop exit
PB: predicated region body
PF: predicated region fallthrough
CT: control target
= control target key end

     0   :  { %vm25_vm0 = vcmask 261120   ;;  %s483_s0 = inlined_call_operand.vmem [shape: f32[16,32], index: 0, kind: input, shape index: {}]   ;;  %s484_s1 = inlined_call_operand.vmem [shape: f32[32,128], index: 1, kind: input, shape index: {}]   ;;  %s485_s2 = inlined_call_operand.vmem [shape: f32[1,128], index: 2, kind: input, shape index: {}]   ;;  %s486_s3 = inlined_call_operand.vmem [shape: f32[128,32], index: 3, kind: input, shape index: {}]   ;;  %s487_s4 = inlined_call_operand.vmem [shape: f32[1,32], index: 4, kind: input, shape index: {}]   ;;  %s488_s5 = inlined_call_operand.hbm [shape: f32[16,32], index: 5, kind: output, shape index: {}]  }
   0x1   :  { %v33_v0 = vld [vmem:[%s484_s1 + $0x18] sm:$0xff]  ;;  %v32_v1 = vld [vmem:[%s484_s1 + $0x10] sm:$0xff]  ;;  %v28_v2 = vld [vmem:[%s483_s0] sm:$0xff] }
   0x2   :  { %290 = vmatprep.subr.mxu0 %v33_v0  ;;  %v31_v3 = vld [vmem:[%s484_s1 + $0x8] sm:$0xff]  ;;  %298 = vmatprep.mubr.msk.f32.mxu0 %vm25_vm0, %v28_v2  ;;  %v150_v4 = vld [vmem:[%s486_s3 + $0x78] sm:$0xff]  ;;  %v149_v5 = vld [vmem:[%s486_s3 + $0x70] sm:$0xff] }
   0x3   :  { %291 = vmatpush3.msra.mxu0 %v33_v0  ;;  %301 = vmatprep.subr.mxu1 %v150_v4 }
   0x4   :  { %292 = vmatprep.subr.mxu0 %v32_v1 }
   0x5   :  { %10 = vsyncpa [#allocation4], 0  ;;  %293 = vmatpush3.msra.mxu0 %v32_v1  ;;  %v30_v6 = vld [vmem:[%s484_s1] sm:$0xff]  ;;  %302 = vmatpush3.msra.mxu1 %v150_v4  ;;  %v148_v7 = vld [vmem:[%s486_s3 + $0x68] sm:$0xff]  ;;  %v366_v22 = vmov 0.0   ;;  %s367_s11 = smov [#allocation3]  }
   0x6   :  { %294 = vmatprep.subr.mxu0 %v31_v3  ;;  %303 = vmatprep.subr.mxu1 %v149_v5  ;;  %v29_v8 = vld [vmem:[%s483_s0 + $0x8] sm:$0xff]  ;;  %v147_v9 = vld [vmem:[%s486_s3 + $0x60] sm:$0xff]  ;;  %v146_v10 = vld [vmem:[%s486_s3 + $0x58] sm:$0xff]  ;;  %27 = vst.msk [vmem:[#allocation2 + $0x8] sm:$0xff] %vm25_vm0, %v366_v22  ;;  %s251_s12 = sshll.u32 %s367_s11, 4  ;;  %s252_s12 = int_to_ptr.vmem [resolvable:$true] %s251_s12 }
   0x7   :  { %295 = vmatpush3.msra.mxu0 %v31_v3  ;;  %304 = vmatpush3.msra.mxu1 %v149_v5  ;;  %v145_v11 = vld [vmem:[%s486_s3 + $0x50] sm:$0xff]  ;;  %v144_v12 = vld [vmem:[%s486_s3 + $0x48] sm:$0xff]  ;;  %v143_v13 = vld [vmem:[%s486_s3 + $0x40] sm:$0xff]  ;;  %26 = vst.msk [vmem:[#allocation2] sm:$0xff] %vm25_vm0, %v366_v22  ;;  %s344_s13 = scalar_lea.vmem %s252_s12, 256  ;;  %p349_p1 = scmp.lt.s32.totalorder %s252_s12, %s252_s12 }
   0x8   :  { %296 = vmatprep.subr.mxu0 %v30_v6  ;;  %305 = vmatprep.subr.mxu1 %v148_v7  ;;  %v142_v14 = vld [vmem:[%s486_s3 + $0x38] sm:$0xff]  ;;  %v141_v15 = vld [vmem:[%s486_s3 + $0x30] sm:$0xff]  ;;  %v140_v16 = vld [vmem:[%s486_s3 + $0x28] sm:$0xff]  ;;  %p345_p0 = scmp.ne.s32.totalorder %s252_s12, %s344_s13  ;;  %p350_p2 = scmp.lt.s32.totalorder %s344_s13, %s344_s13 }
   0x9   :  { %297 = vmatpush3.msra.mxu0 %v30_v6  ;;  %306 = vmatpush3.msra.mxu1 %v148_v7  ;;  %v139_v17 = vld [vmem:[%s486_s3 + $0x20] sm:$0xff]  ;;  %v138_v18 = vld [vmem:[%s486_s3 + $0x18] sm:$0xff]  ;;  %v137_v19 = vld [vmem:[%s486_s3 + $0x10] sm:$0xff] }
   0xa   :  { %299 = vmatmul.mubr.msk.f32.vlgmr.msra.gmra.mxu0 %vm25_vm0, %v29_v8  ;;  %307 = vmatprep.subr.mxu1 %v147_v9  ;;  %v136_v20 = vld [vmem:[%s486_s3 + $0x8] sm:$0xff]  ;;  %v135_v21 = vld [vmem:[%s486_s3] sm:$0xff]  ;;  %p351_p3 = por %p350_p2, %p349_p1 }
   0xb   :  { %308 = vmatpush3.msra.mxu1 %v147_v9  ;;  %v262_v23 = vld [vmem:[%s485_s2] ss:$0 sm:$0xff] }
   0xc   :  { %309 = vmatprep.subr.mxu1 %v146_v10  ;;  %v265_v44 = vld [vmem:[%s487_s4] ss:$0 sm:$0xff]  ;;  %p352_p4 = pnand %p351_p3, %p345_p0 }
   0xd   :  { %310 = vmatpush3.msra.mxu1 %v146_v10  ;;  %v134_v38 = vld [vmem:[#allocation2 + $0x8] sm:$0xff] }
   0xe   :  { %311 = vmatprep.subr.mxu1 %v145_v11  ;;  %v133_v40 = vld [vmem:[#allocation2] sm:$0xff] }
   0xf   :  { %312 = vmatpush3.msra.mxu1 %v145_v11 }
  0x10   :  { %313 = vmatprep.subr.mxu1 %v144_v12 }
  0x11   :  { %314 = vmatpush3.msra.mxu1 %v144_v12 }
  0x12   :  { %315 = vmatprep.subr.mxu1 %v143_v13 }
  0x13   :  { %316 = vmatpush3.msra.mxu1 %v143_v13 }
  0x14   :  { %317 = vmatprep.subr.mxu1 %v142_v14 }
  0x15   :  { %318 = vmatpush3.msra.mxu1 %v142_v14 }
  0x16   :  { %319 = vmatprep.subr.mxu1 %v141_v15 }
  0x17   :  { %320 = vmatpush3.msra.mxu1 %v141_v15 }
  0x18   :  { %321 = vmatprep.subr.mxu1 %v140_v16 }
  0x19   :  { %322 = vmatpush3.msra.mxu1 %v140_v16 }
  0x1a   :  { %323 = vmatprep.subr.mxu1 %v139_v17 }
  0x1b   :  { %324 = vmatpush3.msra.mxu1 %v139_v17 }
  0x1c   :  { %325 = vmatprep.subr.mxu1 %v138_v18 }
  0x1d   :  { %326 = vmatpush3.msra.mxu1 %v138_v18 }
  0x1e   :  { %327 = vmatprep.subr.mxu1 %v137_v19 }
  0x1f   :  { %328 = vmatpush3.msra.mxu1 %v137_v19 }
  0x20   :  { %329 = vmatprep.subr.mxu1 %v136_v20 }
  0x21   :  { %330 = vmatpush3.msra.mxu1 %v136_v20 }
  0x22   :  { %331 = vmatprep.subr.mxu1 %v135_v21 }
  0x23   :  { %332 = vmatpush3.msra.mxu1 %v135_v21 }
  0xca   :  { %v300_v24 = vpop.f32.mrf.mxu0 }
  0xcb   :  { %v120_v25 = vadd.f32 %v300_v24, %v262_v23 }
  0xcc   :  { %v114_v26 = vpop.f32.mrf.mxu0 }
  0xcd   :  { %v126_v27 = vmul.f32 0.70710677, %v120_v25  ;;  %v115_v28 = vadd.f32 %v262_v23, %v114_v26  ;;  %v124_v35 = vmul.f32 0.5, %v120_v25 }
  0xcf   :  { %340 = verf.f32 %v126_v27  ;;  %v125_v29 = vmul.f32 0.70710677, %v115_v28  ;;  %v123_v33 = vmul.f32 0.5, %v115_v28 }
  0xd1   :  { %342 = verf.f32 %v125_v29 }
  0xdc   :  { %v341_v30 = vpop.eup %340 }
  0xdd   :  { %v130_v32 = vadd.f32 1.0, %v341_v30 }
  0xde   :  { %v343_v31 = vpop.eup %342 }
  0xdf   :  { %v129_v34 = vadd.f32 1.0, %v343_v31  ;;  %v132_v37 = vmul.f32 %v130_v32, %v124_v35 }
  0xe1   :  { %v131_v36 = vmul.f32 %v129_v34, %v123_v33 }
  0xe3   :  { %333 = vmatprep.mubr.f32.mxu1 %v131_v36 }
  0xe4   :  { %334 = vmatmul.mubr.f32.vlgmr.msra.gmra.mxu1 %v132_v37 }
 0x1a4   :  { %v335_v39 = vpop.f32.mrf.mxu1 }
 0x1a5   :  { %v227_v41 = vadd.f32 %v335_v39, %v134_v38 }
 0x1a6   :  { %v217_v42 = vpop.f32.mrf.mxu1 }
 0x1a7   :  { %229 = vst.msk [vmem:[#allocation2 + $0x8] sm:$0xff] %vm25_vm0, %v227_v41  ;;  %v226_v43 = vadd.f32 %v217_v42, %v133_v40 }
 0x1a9   :  { %228 = vst.msk [vmem:[#allocation2] sm:$0xff] %vm25_vm0, %v226_v43 }
 0x1ae   :  { %v234_v45 = vld [vmem:[#allocation2 + $0x8] sm:$0xff] }
 0x1af   :  { %v243_v46 = vadd.f32 %v265_v44, %v234_v45 }
 0x1b0   :  { %v233_v47 = vld [vmem:[#allocation2] sm:$0xff] }
 0x1b1   :  { %v242_v48 = vadd.f32 %v265_v44, %v233_v47  ;;  %245 = vst.msk [vmem:[#allocation3 + $0x8] sm:$0xff] %vm25_vm0, %v243_v46 }
 0x1b3   :  { %244 = vst.msk [vmem:[#allocation3] sm:$0xff] %vm25_vm0, %v242_v48 }
 0x1b4   :  { %355 = shalt.err (!%p352_p4)
}
 0x1b5   :  { %s368_s0 = smov 128   ;;  %s369_s4 = smov 8  }
 0x1b6   :  { %257 = dma.vmem_to_hbm [thread:$0]  %s252_s12, 256, %s488_s5, [#allocation4], %s368_s0, %s368_s0, %s369_s4  }
 0x1b7   :  { %364 = dma.done.wait [#allocation4], 256  }
 0x1b8   :  { %365 = vsyncadd [#allocation4], 4294967040 }
 0x1b9   :  { %261 = vsyncpa [#allocation4], 1 }

</bundles_post_ra>
